<compile_context>
chip_gen: v6e
topology: v6e:2x2x1
jax: 0.10.0
libtpu: 0.0.40
codegen_flags: <defaults>
</compile_context>

<pallas_src>
import functools

import jax
import jax.numpy as jnp
from jax import lax
from jax.experimental import pallas as pl
from jax.experimental.pallas import tpu as pltpu

_SQRT_HALF = 0.7071067811865476  # 1/sqrt(2), hoisted python constant


def _gelu_exact(x):
    # Exact (erf-based) GELU, matching torch.nn.GELU() default.
    return 0.5 * x * (1.0 + lax.erf(x * _SQRT_HALF))


def _ffn_kernel_fused(x_ref, w1_ref, b1_ref, w2_ref, b2_ref, o_ref):
    # Single hidden chunk: whole MLP in one grid step, no accumulator scratch.
    #   x_ref : (TM, dim)   w1_ref: (dim, H)   b1_ref: (1, H)
    #   w2_ref: (H, dim)    b2_ref: (1, dim)   o_ref : (TM, dim)
    h = jnp.dot(x_ref[...], w1_ref[...], preferred_element_type=jnp.float32)
    h = _gelu_exact(h + b1_ref[...].astype(jnp.float32))
    # Dropout(p=0.0) -> identity (inference path).
    y = jnp.dot(h.astype(w2_ref.dtype), w2_ref[...],
                preferred_element_type=jnp.float32)
    o_ref[...] = (y + b2_ref[...].astype(jnp.float32)).astype(o_ref.dtype)


def _ffn_kernel_chunked(x_ref, w1_ref, b1_ref, w2_ref, b2_ref, o_ref, acc_ref):
    # Grid: (i over M tiles [parallel], k over hidden chunks [arbitrary]).
    #   x_ref : (TM, dim)      block (i, 0)
    #   w1_ref: (dim, TK)      block (0, k)
    #   b1_ref: (1, TK)        block (0, k)
    #   w2_ref: (TK, dim)      block (k, 0)
    #   b2_ref: (1, dim)       block (0, 0)
    #   o_ref : (TM, dim)      block (i, 0)   (written on last k)
    #   acc_ref: (TM, dim) f32 VMEM scratch accumulator
    k = pl.program_id(1)

    @pl.when(k == 0)
    def _():
        # Seed the accumulator with b2: saves the final bias add.
        acc_ref[...] = jnp.broadcast_to(
            b2_ref[...], acc_ref.shape).astype(jnp.float32)

    h = jnp.dot(x_ref[...], w1_ref[...], preferred_element_type=jnp.float32)
    h = _gelu_exact(h + b1_ref[...].astype(jnp.float32))
    # Dropout(p=0.0) -> identity.  Partial sum of the second matmul:
    acc_ref[...] += jnp.dot(h.astype(w2_ref.dtype), w2_ref[...],
                            preferred_element_type=jnp.float32)

    @pl.when(k == pl.num_programs(1) - 1)
    def _():
        o_ref[...] = acc_ref[...].astype(o_ref.dtype)


def _choose_block_m(m, dim, itemsize):
    # MXU / sublane aligned M tile under a VMEM budget:
    #   x (2x double-buffered) + out (2x) in input dtype + f32 accumulator.
    if m < 128:
        return max(8, ((m + 7) // 8) * 8)
    budget = 24 * 1024 * 1024
    for cand in (512, 256, 128):
        if cand * dim * (4 * itemsize + 4) <= budget:
            return cand
    return 128


def _choose_block_h(hidden, dim, itemsize):
    # Largest lane-aligned hidden chunk whose double-buffered (dim, tk) +
    # (tk, dim) weight slices stay within budget; fall back to the full hidden
    # dim when it is not a multiple of 128 (BlockSpec requires 128-divisible
    # or full extent on the lane axis).
    budget = 16 * 1024 * 1024
    for cand in (1024, 512, 256, 128):
        if hidden % cand == 0 and 4 * dim * cand * itemsize <= budget:
            return cand
    return hidden


@functools.partial(jax.jit, static_argnames=("block_m", "block_h"))
def feedforward(x, w1, b1, w2, b2, *, block_m=None, block_h=None):
    """x: (B, N, dim). w1: (dim, hidden), b1: (hidden,), w2: (hidden, dim), b2: (dim,)."""
    B, N, dim = x.shape
    hidden = w1.shape[1]
    M = B * N
    itemsize = jnp.dtype(x.dtype).itemsize

    if block_m is None:
        block_m = _choose_block_m(M, dim, itemsize)
    if block_h is None:
        block_h = _choose_block_h(hidden, dim, itemsize)
    assert hidden % block_h == 0, "block_h must divide hidden"

    # Pad rows so the grid covers every row (no silent remainder drop).
    grid_m = pl.cdiv(M, block_m)
    M_pad = grid_m * block_m
    x2 = x.reshape(M, dim)
    if M_pad != M:
        x2 = jnp.pad(x2, ((0, M_pad - M), (0, 0)))

    grid_h = hidden // block_h
    b1_2 = b1.reshape(1, hidden)
    b2_2 = b2.reshape(1, dim)

    # Advisory cost estimate for the XLA scheduler.
    cost = pl.CostEstimate(
        flops=4 * M_pad * dim * hidden,
        transcendentals=M_pad * hidden,
        bytes_accessed=(M_pad * dim * 2 + dim * hidden * 2 + hidden + dim)
        * itemsize,
    )

    # Per-step VMEM: double-buffered x/out tiles + weight/bias slices + f32 acc.
    vmem_est = (2 * (block_m * dim * 2
                     + dim * block_h + block_h * dim
                     + block_h + dim) * itemsize
                + block_m * dim * 4)
    vmem_limit = max(32 * 1024 * 1024,
                     min(64 * 1024 * 1024, int(vmem_est * 3 // 2)))

    x_spec = pl.BlockSpec((block_m, dim), lambda i, k: (i, 0))
    o_spec = pl.BlockSpec((block_m, dim), lambda i, k: (i, 0))
    w1_spec = pl.BlockSpec((dim, block_h), lambda i, k: (0, k))
    b1_spec = pl.BlockSpec((1, block_h), lambda i, k: (0, k))
    w2_spec = pl.BlockSpec((block_h, dim), lambda i, k: (k, 0))
    b2_spec = pl.BlockSpec((1, dim), lambda i, k: (0, 0))

    if grid_h == 1:
        kernel = _ffn_kernel_fused
        scratch_shapes = []
    else:
        kernel = _ffn_kernel_chunked
        scratch_shapes = [pltpu.VMEM((block_m, dim), jnp.float32)]

    out = pl.pallas_call(
        kernel,
        out_shape=jax.ShapeDtypeStruct((M_pad, dim), x.dtype),
        grid_spec=pltpu.PrefetchScalarGridSpec(
            num_scalar_prefetch=0,
            grid=(grid_m, grid_h),
            in_specs=[x_spec, w1_spec, b1_spec, w2_spec, b2_spec],
            out_specs=o_spec,
            scratch_shapes=scratch_shapes,
        ),
        compiler_params=pltpu.CompilerParams(
            dimension_semantics=("parallel", "arbitrary"),
            vmem_limit_bytes=vmem_limit,
        ),
        cost_estimate=cost,
    )(x2, w1, b1_2, w2, b2_2)

    return out[:M].reshape(B, N, dim)


def _init_params(key, dim, hidden_dim, dtype=jnp.float32):
    # PyTorch nn.Linear default init: U(-1/sqrt(fan_in), 1/sqrt(fan_in)).
    k1, k2, k3, k4 = jax.random.split(key, 4)
    bound1 = 1.0 / jnp.sqrt(dim)
    bound2 = 1.0 / jnp.sqrt(hidden_dim)
    # Stored already transposed relative to torch: W1 (dim, hidden), W2 (hidden, dim).
    w1 = jax.random.uniform(k1, (dim, hidden_dim), dtype, -bound1, bound1)
    b1 = jax.random.uniform(k2, (hidden_dim,), dtype, -bound1, bound1)
    w2 = jax.random.uniform(k3, (hidden_dim, dim), dtype, -bound2, bound2)
    b2 = jax.random.uniform(k4, (dim,), dtype, -bound2, bound2)
    return w1, b1, w2, b2


def _reference(x, w1, b1, w2, b2):
    h = jnp.dot(x, w1) + b1
    h = 0.5 * h * (1.0 + lax.erf(h * _SQRT_HALF))
    return jnp.dot(h, w2) + b2


if __name__ == "__main__":
    key = jax.random.PRNGKey(0)

    # Test 1: small module-consistent shapes; seq non-multiple-of-8 exercises
    # the padded-remainder path and the fused (single hidden chunk) kernel.
    batch, seq, dim, hidden_dim = 2, 9, 32, 64
    kx, kp, key = jax.random.split(key, 3)
    x = jax.random.normal(kx, (batch, seq, dim), jnp.float32)
    w1, b1, w2, b2 = _init_params(kp, dim, hidden_dim)
    y = jax.block_until_ready(feedforward(x, w1, b1, w2, b2))
    y_ref = _reference(x, w1, b1, w2, b2)
    assert y.shape == (batch, seq, dim)
    assert jnp.allclose(y, y_ref, atol=1e-5, rtol=1e-5), "fused path mismatch"

    # Test 2: force the chunked (hidden-reduction + accumulator) path.
    batch2, seq2, dim2, hidden2 = 2, 20, 128, 256
    kx2, kp2, key = jax.random.split(key, 3)
    x2 = jax.random.normal(kx2, (batch2, seq2, dim2), jnp.float32)
    w1b, b1b, w2b, b2b = _init_params(kp2, dim2, hidden2)
    y2 = jax.block_until_ready(
        feedforward(x2, w1b, b1b, w2b, b2b, block_h=128))
    y2_ref = _reference(x2, w1b, b1b, w2b, b2b)
    assert y2.shape == (batch2, seq2, dim2)
    assert jnp.allclose(y2, y2_ref, atol=1e-4, rtol=1e-4), "chunked path mismatch"

    print("KERNEL_OK")
</pallas_src>

<mosaic_0001>
module attributes {stable_mosaic.version = 11 : i64} {
  func.func @_ffn_kernel_fused(%arg0: i32, %arg1: i32, %arg2: memref<24x32xf32, #tpu.memory_space<vmem>>, %arg3: memref<32x64xf32, #tpu.memory_space<vmem>>, %arg4: memref<1x64xf32, #tpu.memory_space<vmem>>, %arg5: memref<64x32xf32, #tpu.memory_space<vmem>>, %arg6: memref<1x32xf32, #tpu.memory_space<vmem>>, %arg7: memref<24x32xf32, #tpu.memory_space<vmem>>) attributes {dimension_semantics = [#tpu.dimension_semantics<parallel>, #tpu.dimension_semantics<arbitrary>], iteration_bounds = array<i64: 1, 1>, scalar_prefetch = 0 : i64, scratch_operands = 0 : i64, tpu.core_type = #tpu.core_type<tc>, window_params = [{transform_indices = @transform_0, window_bounds = array<i64: 24, 32>}, {transform_indices = @transform_1, window_bounds = array<i64: 32, 64>}, {transform_indices = @transform_2, window_bounds = array<i64: 1, 64>}, {transform_indices = @transform_3, window_bounds = array<i64: 64, 32>}, {pipeline_mode = #tpu.pipeline_mode<synchronous>, transform_indices = @transform_4, window_bounds = array<i64: 1, 32>}, {transform_indices = @transform_5, window_bounds = array<i64: 24, 32>}]} {
    %c0 = arith.constant 0 : index
    %c0_0 = arith.constant 0 : index
    %0 = vector.load %arg2[%c0, %c0_0] : memref<24x32xf32, #tpu.memory_space<vmem>>, vector<24x32xf32>
    %c0_1 = arith.constant 0 : index
    %c0_2 = arith.constant 0 : index
    %1 = vector.load %arg3[%c0_1, %c0_2] : memref<32x64xf32, #tpu.memory_space<vmem>>, vector<32x64xf32>
    %cst = arith.constant dense<0.000000e+00> : vector<24x64xf32>
    %2 = tpu.matmul %0, %1, %cst {dimension_numbers = #tpu.dot_dimension_numbers<[1], [0], [0], [1], [0, 0, 1, 1], [], []>} : vector<24x32xf32>, vector<32x64xf32>, vector<24x64xf32> -> vector<24x64xf32>
    %c0_3 = arith.constant 0 : index
    %c0_4 = arith.constant 0 : index
    %3 = vector.load %arg4[%c0_3, %c0_4] : memref<1x64xf32, #tpu.memory_space<vmem>>, vector<1x64xf32>
    %4 = vector.broadcast %3 : vector<1x64xf32> to vector<24x64xf32>
    %5 = arith.addf %2, %4 : vector<24x64xf32>
    %cst_5 = arith.constant 5.000000e-01 : f32
    %6 = vector.broadcast %cst_5 : f32 to vector<24x64xf32>
    %7 = arith.mulf %6, %5 : vector<24x64xf32>
    %cst_6 = arith.constant 0.707106769 : f32
    %8 = vector.broadcast %cst_6 : f32 to vector<24x64xf32>
    %9 = arith.mulf %5, %8 : vector<24x64xf32>
    %10 = math.erf %9 : vector<24x64xf32>
    %cst_7 = arith.constant 1.000000e+00 : f32
    %11 = vector.broadcast %cst_7 : f32 to vector<24x64xf32>
    %12 = arith.addf %11, %10 : vector<24x64xf32>
    %13 = arith.mulf %7, %12 : vector<24x64xf32>
    %c0_8 = arith.constant 0 : index
    %c0_9 = arith.constant 0 : index
    %14 = vector.load %arg5[%c0_8, %c0_9] : memref<64x32xf32, #tpu.memory_space<vmem>>, vector<64x32xf32>
    %cst_10 = arith.constant dense<0.000000e+00> : vector<24x32xf32>
    %15 = tpu.matmul %13, %14, %cst_10 {dimension_numbers = #tpu.dot_dimension_numbers<[1], [0], [0], [1], [0, 0, 1, 1], [], []>} : vector<24x64xf32>, vector<64x32xf32>, vector<24x32xf32> -> vector<24x32xf32>
    %c0_11 = arith.constant 0 : index
    %c0_12 = arith.constant 0 : index
    %16 = vector.load %arg6[%c0_11, %c0_12] : memref<1x32xf32, #tpu.memory_space<vmem>>, vector<1x32xf32>
    %17 = vector.broadcast %16 : vector<1x32xf32> to vector<24x32xf32>
    %18 = arith.addf %15, %17 : vector<24x32xf32>
    %c0_13 = arith.constant 0 : index
    %c0_14 = arith.constant 0 : index
    %19 = vector.load %arg7[%c0_13, %c0_14] : memref<24x32xf32, #tpu.memory_space<vmem>>, vector<24x32xf32>
    tpu.vector_store %arg7[%c0_13, %c0_14], %18 {strides = array<i32>} : memref<24x32xf32, #tpu.memory_space<vmem>>, vector<24x32xf32>,
    return
  }
  func.func @transform_0(%arg0: i32, %arg1: i32) -> (i32, i32) {
    %c0_i32 = arith.constant 0 : i32
    %c0_i32_0 = arith.constant 0 : i32
    return %arg0, %c0_i32 : i32, i32
  }
  func.func @transform_1(%arg0: i32, %arg1: i32) -> (i32, i32) {
    %c0_i32 = arith.constant 0 : i32
    %c0_i32_0 = arith.constant 0 : i32
    return %c0_i32, %arg1 : i32, i32
  }
  func.func @transform_2(%arg0: i32, %arg1: i32) -> (i32, i32) {
    %c0_i32 = arith.constant 0 : i32
    %c0_i32_0 = arith.constant 0 : i32
    return %c0_i32, %arg1 : i32, i32
  }
  func.func @transform_3(%arg0: i32, %arg1: i32) -> (i32, i32) {
    %c0_i32 = arith.constant 0 : i32
    %c0_i32_0 = arith.constant 0 : i32
    return %arg1, %c0_i32 : i32, i32
  }
  func.func @transform_4(%arg0: i32, %arg1: i32) -> (i32, i32) {
    %c0_i32 = arith.constant 0 : i32
    %c0_i32_0 = arith.constant 0 : i32
    %c0_i32_1 = arith.constant 0 : i32
    return %c0_i32, %c0_i32_0 : i32, i32
  }
  func.func @transform_5(%arg0: i32, %arg1: i32) -> (i32, i32) {
    %c0_i32 = arith.constant 0 : i32
    %c0_i32_0 = arith.constant 0 : i32
    return %arg0, %c0_i32 : i32, i32
  }
}

</mosaic_0001>

<bundles_post_ra>
// kernel: feedforward.1
= control target key start
LH: loop header
LB: loop body
LE: loop exit
PB: predicated region body
PF: predicated region fallthrough
CT: control target
= control target key end

     0   :  { %v327_v0 = vmov 0.0   ;;  %vm328_vm0 = vmmov 0   ;;  %vm34_vm1 = vcmask 261120   ;;  %vm154_vm2 = vcmask 523264   ;;  %s449_s1 = inlined_call_operand.vmem [shape: f32[32,64], index: 1, kind: input, shape index: {}]   ;;  %s450_s0 = inlined_call_operand.vmem [shape: f32[24,32], index: 0, kind: input, shape index: {}]   ;;  %s451_s3 = inlined_call_operand.vmem [shape: f32[64,32], index: 3, kind: input, shape index: {}]   ;;  %s452_s2 = inlined_call_operand.vmem [shape: f32[1,64], index: 2, kind: input, shape index: {}]   ;;  %s453_s4 = inlined_call_operand.vmem [shape: f32[1,32], index: 4, kind: input, shape index: {}]   ;;  %s454_s5 = inlined_call_operand.vmem [shape: f32[24,32], index: 5, kind: output, shape index: {}]  }
   0x1   :  { %277 = vmatprep.subr.mxu0 %v327_v0  ;;  %v26_v1 = vld [vmem:[%s449_s1 + $0x18] sm:$0xff]  ;;  %v25_v2 = vld [vmem:[%s449_s1 + $0x10] sm:$0xff]  ;;  %285 = vmatprep.mubr.msk.f32.mxu0 %vm328_vm0, %v327_v0  ;;  %v24_v3 = vld [vmem:[%s449_s1 + $0x8] sm:$0xff] }
   0x2   :  { %278 = vmatpush3.msra.mxu0 %v26_v1  ;;  %294 = vmatprep.subr.mxu1 %v327_v0  ;;  %v23_v4 = vld [vmem:[%s449_s1] sm:$0xff]  ;;  %v21_v6 = vld [vmem:[%s450_s0 + $0x8] sm:$0xff]  ;;  %v22_v7 = vld [vmem:[%s450_s0 + $0x10] sm:$0xff] }
   0x3   :  { %279 = vmatprep.subr.mxu0 %v327_v0  ;;  %310 = vmatprep.mubr.msk.f32.mxu1 %vm328_vm0, %v327_v0  ;;  %v20_v5 = vld [vmem:[%s450_s0] sm:$0xff]  ;;  %v146_v8 = vld [vmem:[%s451_s3 + $0x38] sm:$0xff]  ;;  %v145_v9 = vld [vmem:[%s451_s3 + $0x30] sm:$0xff] }
   0x4   :  { %280 = vmatpush3.msra.mxu0 %v25_v2  ;;  %295 = vmatpush3.msra.mxu1 %v146_v8  ;;  %v144_v10 = vld [vmem:[%s451_s3 + $0x28] sm:$0xff]  ;;  %v143_v11 = vld [vmem:[%s451_s3 + $0x20] sm:$0xff]  ;;  %v142_v12 = vld [vmem:[%s451_s3 + $0x18] sm:$0xff] }
   0x5   :  { %281 = vmatprep.subr.mxu0 %v327_v0  ;;  %296 = vmatprep.subr.mxu1 %v327_v0  ;;  %v141_v13 = vld [vmem:[%s451_s3 + $0x10] sm:$0xff]  ;;  %v140_v14 = vld [vmem:[%s451_s3 + $0x8] sm:$0xff]  ;;  %v139_v15 = vld [vmem:[%s451_s3] sm:$0xff] }
   0x6   :  { %282 = vmatpush3.msra.mxu0 %v24_v3  ;;  %297 = vmatpush3.msra.mxu1 %v145_v9  ;;  %v251_v16 = vld [vmem:[%s452_s2] ss:$0 sm:$0xff] }
   0x7   :  { %283 = vmatprep.subr.mxu0 %v327_v0  ;;  %298 = vmatprep.subr.mxu1 %v327_v0  ;;  %v255_v41 = vld [vmem:[%s453_s4] ss:$0 sm:$0xff] }
   0x8   :  { %284 = vmatpush3.msra.mxu0 %v23_v4  ;;  %299 = vmatpush3.msra.mxu1 %v144_v10 }
   0x9   :  { %286 = vmatmul.mubr.msk.f32.vlgmr.msra.gmra.mxu0 %vm34_vm1, %v20_v5  ;;  %300 = vmatprep.subr.mxu1 %v327_v0 }
   0xa   :  { %288 = vmatprep.mubr.msk.f32.mxu0 %vm328_vm0, %v327_v0  ;;  %301 = vmatpush3.msra.mxu1 %v143_v11 }
   0xb   :  { %302 = vmatprep.subr.mxu1 %v327_v0 }
   0xc   :  { %303 = vmatpush3.msra.mxu1 %v142_v12 }
   0xd   :  { %289 = vmatmul.mubr.msk.f32.gmra.mxu0 %vm34_vm1, %v21_v6  ;;  %304 = vmatprep.subr.mxu1 %v327_v0 }
   0xe   :  { %291 = vmatprep.mubr.msk.f32.mxu0 %vm328_vm0, %v327_v0  ;;  %305 = vmatpush3.msra.mxu1 %v141_v13 }
   0xf   :  { %306 = vmatprep.subr.mxu1 %v327_v0 }
  0x10   :  { %307 = vmatpush3.msra.mxu1 %v140_v14 }
  0x11   :  { %292 = vmatmul.mubr.msk.f32.gmra.mxu0 %vm34_vm1, %v22_v7  ;;  %308 = vmatprep.subr.mxu1 %v327_v0 }
  0x12   :  { %309 = vmatpush3.msra.mxu1 %v139_v15 }
  0xc9   :  { %v110_v17 = vpop.f32.mrf.mxu0 }
  0xca   :  { %v111_v18 = vadd.f32 %v251_v16, %v110_v17 }
  0xcb   :  { %v287_v19 = vpop.f32.mrf.mxu0 }
  0xcc   :  { %v127_v20 = vmul.f32 0.70710677, %v111_v18  ;;  %v124_v30 = vmul.f32 0.5, %v111_v18 }
  0xcd   :  { %v115_v21 = vpop.f32.mrf.mxu0 }
  0xce   :  { %321 = verf.f32 %v127_v20  ;;  %v116_v22 = vadd.f32 %v251_v16, %v115_v21 }
  0xcf   :  { %v290_v23 = vpop.f32.mrf.mxu0 }
  0xd0   :  { %v128_v24 = vmul.f32 0.70710677, %v116_v22  ;;  %v125_v34 = vmul.f32 0.5, %v116_v22 }
  0xd1   :  { %v120_v25 = vpop.f32.mrf.mxu0 }
  0xd2   :  { %323 = verf.f32 %v128_v24  ;;  %v121_v26 = vadd.f32 %v251_v16, %v120_v25 }
  0xd3   :  { %v293_v27 = vpop.f32.mrf.mxu0 }
  0xd4   :  { %v129_v28 = vmul.f32 0.70710677, %v121_v26  ;;  %v126_v38 = vmul.f32 0.5, %v121_v26 }
  0xd6   :  { %325 = verf.f32 %v129_v28 }
  0xdb   :  { %v322_v29 = vpop.eup %321 }
  0xdc   :  { %v133_v31 = vadd.f32 1.0, %v322_v29 }
  0xde   :  { %v136_v32 = vmul.f32 %v133_v31, %v124_v30 }
  0xdf   :  { %v324_v33 = vpop.eup %323 }
  0xe0   :  { %v134_v35 = vadd.f32 1.0, %v324_v33  ;;  %311 = vmatmul.mubr.msk.f32.vlgmr.msra.gmra.mxu1 %vm154_vm2, %v136_v32 }
  0xe1   :  { %313 = vmatprep.mubr.msk.f32.mxu1 %vm328_vm0, %v327_v0 }
  0xe2   :  { %v137_v36 = vmul.f32 %v134_v35, %v125_v34 }
  0xe3   :  { %v326_v37 = vpop.eup %325 }
  0xe4   :  { %v135_v39 = vadd.f32 1.0, %v326_v37  ;;  %314 = vmatmul.mubr.msk.f32.gmra.mxu1 %vm154_vm2, %v137_v36 }
  0xe5   :  { %316 = vmatprep.mubr.msk.f32.mxu1 %vm328_vm0, %v327_v0 }
  0xe6   :  { %v138_v40 = vmul.f32 %v135_v39, %v126_v38 }
  0xe8   :  { %317 = vmatmul.mubr.msk.f32.gmra.mxu1 %vm154_vm2, %v138_v40 }
 0x1a0   :  { %v230_v42 = vpop.f32.mrf.mxu1 }
 0x1a1   :  { %v231_v43 = vadd.f32 %v255_v41, %v230_v42 }
 0x1a2   :  { %v312_v44 = vpop.f32.mrf.mxu1 }
 0x1a3   :  { %244 = vst.msk [vmem:[%s454_s5] sm:$0xff] %vm34_vm1, %v231_v43 }
 0x1a4   :  { %v235_v45 = vpop.f32.mrf.mxu1 }
 0x1a5   :  { %v236_v46 = vadd.f32 %v255_v41, %v235_v45 }
 0x1a6   :  { %v315_v47 = vpop.f32.mrf.mxu1 }
 0x1a7   :  { %245 = vst.msk [vmem:[%s454_s5 + $0x8] sm:$0xff] %vm34_vm1, %v236_v46 }
 0x1a8   :  { %v240_v48 = vpop.f32.mrf.mxu1 }
 0x1a9   :  { %v241_v49 = vadd.f32 %v255_v41, %v240_v48 }
 0x1aa   :  { %v318_v50 = vpop.f32.mrf.mxu1 }
 0x1ab   :  { %246 = vst.msk [vmem:[%s454_s5 + $0x10] sm:$0xff] %vm34_vm1, %v241_v49 }

</bundles_post_ra>
